<compile_context>
chip_gen: v5e
topology: v5e:2x2
jax: 0.10.0
libtpu: 0.0.40
codegen_flags: <defaults>
</compile_context>

<pallas_src>
import jax
import jax.numpy as jnp
import numpy as np
from jax.experimental import pallas as pl
from jax.experimental.pallas import tpu as pltpu

NEG_SLOPE = 0.01  # torch.nn.LeakyReLU default

# ---------------- problem constants (synthetic, small) ----------------
MAX_NODES = 8        # tree node slots
NODE_DIM = 4         # node attribute columns: [TYPE, FEATURE, THRESHOLD, ACTIVE]
HIDDEN = 32          # backbone / head hidden dim
N_FEATURES = 5       # feature head output dim
N_THRESHOLDS = 5     # threshold head output dim (continuous=False)
CONTINUOUS = False

ATTR_TYPE, ATTR_FEATURE, ATTR_THRESHOLD, ATTR_ACTIVE = 0, 1, 2, 3
STAGE_COMPLETE, STAGE_LEAF, STAGE_FEATURE, STAGE_THRESHOLD = 0.0, 1.0, 2.0, 3.0

LEAF_INDEX = 0
FEATURE_INDEX = LEAF_INDEX + 2 * MAX_NODES           # 16
THRESHOLD_INDEX = FEATURE_INDEX + N_FEATURES         # 21
OPERATOR_INDEX = THRESHOLD_INDEX + N_THRESHOLDS      # 26
EOS_INDEX = OPERATOR_INDEX + 2 * MAX_NODES           # 42
POLICY_OUTPUT_DIM = EOS_INDEX + 1                    # 43

PAD = 128            # lane-dense padded policy width (output slab & packed head weights)
OP_COL0 = PAD - 2    # scratch lanes inside the packed head output for operator logits

# static binary-tree edge pattern: node i <-> children 2i+1, 2i+2
_e = np.zeros((MAX_NODES, MAX_NODES), np.float32)
for _i in range(MAX_NODES):
    for _c in (2 * _i + 1, 2 * _i + 2):
        if _c < MAX_NODES:
            _e[_i, _c] = 1.0
            _e[_c, _i] = 1.0
TREE_EDGES = jnp.asarray(_e)


# ---------------- the single fused Pallas kernel ----------------
def _fused_forward_kernel(
        x_ref, abd_ref, pool_ref, m0_ref, m1_ref, extra_ref, c0_ref, stage_ref,
        bbw1_ref, bbb1_ref, bbw2_ref, bbb2_ref, bbw3_ref, bbb3_ref,
        lbw_ref, lbb_ref, low_ref, lob_ref, eosw_ref, eosb_ref,
        h1p_ref, h1e_ref, h1b_ref, h2w_ref, h2b_ref,
        o_ref):
    """Entire ForwardTreeModel forward pass for the padded batch, one invocation."""
    f32 = jnp.float32
    a_bd = abd_ref[...]          # (B*N, B*N) block-diagonal normalized adjacency
    pool = pool_ref[...]         # (B, B*N)   masked graph-membership / add-pool matrix

    def leaky(v):
        return jnp.where(v > 0, v, NEG_SLOPE * v)

    def gcn(h, w, b, act=True):
        z = jnp.dot(h, w, preferred_element_type=f32)
        z = jnp.dot(a_bd, z, preferred_element_type=f32) + b
        return leaky(z) if act else z

    # Backbone: 3x GCNConv + LeakyReLU over all graphs at once
    h = gcn(x_ref[...], bbw1_ref[...], bbb1_ref[...])
    h = gcn(h, bbw2_ref[...], bbb2_ref[...])
    h = gcn(h, bbw3_ref[...], bbb3_ref[...])                           # (B*N, H)
    pooled_bb = jnp.dot(pool, h, preferred_element_type=f32)           # (B, H)

    # LeafSelectionHead: body GCN + leaf GCN(H,2) + pooled EOS linear
    h_leaf = gcn(h, lbw_ref[...], lbb_ref[...])                        # (B*N, H)
    leaf_logits = gcn(h_leaf, low_ref[...], lob_ref[...], act=False)   # (B*N, 2)
    pooled_leaf = jnp.dot(pool, h_leaf, preferred_element_type=f32)    # (B, H)
    # scatter node logits into their policy columns (lane-dense matmul placement)
    t = leaf_logits[:, 0:1] * m0_ref[...] + leaf_logits[:, 1:2] * m1_ref[...]
    y_leaf = jnp.dot(pool, t, preferred_element_type=f32)              # (B, PAD)
    leaf_valid = jnp.dot(pool, m0_ref[...] + m1_ref[...],
                         preferred_element_type=f32)                   # (B, PAD) 0/1
    # EOS head, pre-placed at column EOS_INDEX by the padded weight
    y_eos = jnp.dot(pooled_leaf, eosw_ref[...],
                    preferred_element_type=f32) + eosb_ref[...]        # (B, PAD)

    # Feature / Threshold / Operator MLP heads, fused into two lane-dense matmuls
    extra = extra_ref[...]                                             # (B, 2)
    h1 = jnp.dot(pooled_bb, h1p_ref[...], preferred_element_type=f32)
    h1 = h1 + extra[:, 0:1] * h1e_ref[0:1, :] + extra[:, 1:2] * h1e_ref[1:2, :]
    h1 = leaky(h1 + h1b_ref[...])                                      # (B, 3H)
    y2 = jnp.dot(h1, h2w_ref[...], preferred_element_type=f32) + h2b_ref[...]  # (B, PAD)
    y_op0 = y2[:, OP_COL0:OP_COL0 + 1]
    y_op1 = y2[:, OP_COL0 + 1:OP_COL0 + 2]

    # ----- assemble NaN-filled per-stage logits (in-kernel, single wide store) -----
    B = pool.shape[0]
    cols = jax.lax.broadcasted_iota(jnp.int32, (B, PAD), 1)
    c0 = c0_ref[...]                                                   # (B, 1) int32
    stage = stage_ref[...]                                             # (B, 1) f32

    vals_complete = y_leaf + y_eos
    valid_complete = leaf_valid + (cols == EOS_INDEX).astype(f32)
    valid_feat_stage = ((cols >= FEATURE_INDEX) & (cols < THRESHOLD_INDEX)).astype(f32)
    valid_thr_stage = ((cols >= THRESHOLD_INDEX) & (cols < OPERATOR_INDEX)).astype(f32)
    vals_op = jnp.where(cols == c0, y_op0, 0.0) + jnp.where(cols == c0 + 1, y_op1, 0.0)
    valid_op = ((cols == c0) | (cols == c0 + 1)).astype(f32)

    # TODO(synk): ValueError on unrecognized stage has no in-graph equivalent;
    # valid stages are assumed.
    vals = jnp.where(stage == STAGE_COMPLETE, vals_complete,
           jnp.where(stage == STAGE_LEAF, y2,
           jnp.where(stage == STAGE_FEATURE, y2, vals_op)))
    valid = jnp.where(stage == STAGE_COMPLETE, valid_complete,
            jnp.where(stage == STAGE_LEAF, valid_feat_stage,
            jnp.where(stage == STAGE_FEATURE, valid_thr_stage, valid_op)))
    o_ref[...] = jnp.where(valid > 0.5, vals, jnp.nan)


# ---------------- parameters (deterministic synthetic init) ----------------
def init_params(key):
    keys = jax.random.split(key, 24)

    def w(i, fin, fout):
        return 0.1 * jax.random.normal(keys[i], (fin, fout), jnp.float32)

    def b(i, fout):
        return 0.01 * jax.random.normal(keys[i], (fout,), jnp.float32)

    p = {}
    # Backbone: 3 x GCNConv(+LeakyReLU)
    p["bb_w"] = [w(0, NODE_DIM, HIDDEN), w(1, HIDDEN, HIDDEN), w(2, HIDDEN, HIDDEN)]
    p["bb_b"] = [b(3, HIDDEN), b(4, HIDDEN), b(5, HIDDEN)]
    # LeafSelectionHead: body GCNConv + act, leaf GCNConv(H,2), eos Linear(H,1)
    p["leaf_body_w"], p["leaf_body_b"] = w(6, HIDDEN, HIDDEN), b(7, HIDDEN)
    p["leaf_out_w"], p["leaf_out_b"] = w(8, HIDDEN, 2), b(9, 2)
    p["eos_w"], p["eos_b"] = w(10, HIDDEN, 1), b(11, 1)
    # FeatureSelectionHead MLP: Linear(H,H)+act, Linear(H,n_features)
    p["feat_w1"], p["feat_b1"] = w(12, HIDDEN, HIDDEN), b(13, HIDDEN)
    p["feat_w2"], p["feat_b2"] = w(14, HIDDEN, N_FEATURES), b(15, N_FEATURES)
    # ThresholdSelectionHead MLP: Linear(H+1,H)+act, Linear(H,n_thresholds)
    p["th_w1"], p["th_b1"] = w(16, HIDDEN + 1, HIDDEN), b(17, HIDDEN)
    p["th_w2"], p["th_b2"] = w(18, HIDDEN, N_THRESHOLDS), b(19, N_THRESHOLDS)
    # OperatorSelectionHead MLP: Linear(H+2,H)+act, Linear(H,2)
    p["op_w1"], p["op_b1"] = w(20, HIDDEN + 2, HIDDEN), b(21, HIDDEN)
    p["op_w2"], p["op_b2"] = w(22, HIDDEN, 2), b(23, 2)
    return p


def _fuse_params(p):
    """Concatenate / pad head weights into lane-dense operands for the fused kernel."""
    H = HIDDEN

    def row(v):
        return v.reshape(1, -1)

    # EOS linear placed at column EOS_INDEX of a 128-lane slab
    eos_w_p = jnp.zeros((H, PAD), jnp.float32).at[:, EOS_INDEX].set(p["eos_w"][:, 0])
    eos_b_p = jnp.zeros((1, PAD), jnp.float32).at[0, EOS_INDEX].set(p["eos_b"][0])

    # First MLP layer of feature/threshold/operator heads fused into (H+2, 3H)
    zH = jnp.zeros((H,), jnp.float32)
    w_h1_pool = jnp.concatenate([p["feat_w1"], p["th_w1"][:H], p["op_w1"][:H]], axis=1)
    w_h1_extra = jnp.stack([
        jnp.concatenate([zH, p["th_w1"][H], p["op_w1"][H]]),        # feature scalar row
        jnp.concatenate([zH, zH, p["op_w1"][H + 1]]),               # threshold scalar row
    ], axis=0)                                                       # (2, 3H)
    b_h1 = jnp.concatenate([p["feat_b1"], p["th_b1"], p["op_b1"]]).reshape(1, 3 * H)

    # Second MLP layer: block-diagonal, pre-placed into policy columns (128 lanes)
    w_h2 = jnp.zeros((3 * H, PAD), jnp.float32)
    w_h2 = w_h2.at[0:H, FEATURE_INDEX:THRESHOLD_INDEX].set(p["feat_w2"])
    w_h2 = w_h2.at[H:2 * H, THRESHOLD_INDEX:OPERATOR_INDEX].set(p["th_w2"])
    w_h2 = w_h2.at[2 * H:3 * H, OP_COL0:OP_COL0 + 2].set(p["op_w2"])
    b_h2 = jnp.zeros((1, PAD), jnp.float32)
    b_h2 = b_h2.at[0, FEATURE_INDEX:THRESHOLD_INDEX].set(p["feat_b2"])
    b_h2 = b_h2.at[0, THRESHOLD_INDEX:OPERATOR_INDEX].set(p["th_b2"])
    b_h2 = b_h2.at[0, OP_COL0:OP_COL0 + 2].set(p["op_b2"])

    return (p["bb_w"][0], row(p["bb_b"][0]),
            p["bb_w"][1], row(p["bb_b"][1]),
            p["bb_w"][2], row(p["bb_b"][2]),
            p["leaf_body_w"], row(p["leaf_body_b"]),
            p["leaf_out_w"], row(p["leaf_out_b"]),
            eos_w_p, eos_b_p,
            w_h1_pool, w_h1_extra, b_h1,
            w_h2, b_h2)


# ---------------- glue: state -> dense batched graph (Tree.state2pyg analogue) ----------------
def _states_to_dense(x):
    # TODO(synk): Tree.state2pyg builds variable-size torch_geometric graphs; here the
    # equivalent dense padded form is used (absent nodes masked everywhere).
    B = x.shape[0]
    N = MAX_NODES
    nodes = x[:, :N, :]
    maskf = (nodes[:, :, ATTR_TYPE] >= 0.0).astype(jnp.float32)          # (B, N)
    feats = nodes * maskf[:, :, None]                                     # (B, N, 4)

    # adjacency from the static tree-edge pattern (no scatter loop)
    A = TREE_EDGES[None] * (maskf[:, :, None] * maskf[:, None, :])
    A_hat = A + maskf[:, :, None] * jnp.eye(N, dtype=jnp.float32)[None]
    deg = A_hat.sum(-1)
    dinv = jnp.where(deg > 0, 1.0 / jnp.sqrt(deg), 0.0)
    a_norm = dinv[:, :, None] * A_hat * dinv[:, None, :]

    # block-diagonal batched adjacency + masked add-pool matrix
    eye_b = jnp.eye(B, dtype=jnp.float32)
    a_bd = (eye_b[:, None, :, None] * a_norm[:, :, None, :]).reshape(B * N, B * N)
    pool = (eye_b[:, :, None] * maskf[None, :, :]).reshape(B, B * N)
    x_flat = feats.reshape(B * N, NODE_DIM)
    return x_flat, a_bd, pool


def _leaf_placement(B):
    """Constant (B*N, 128) matrices placing node leaf-logit 0/1 at columns 2n / 2n+1."""
    rows = np.arange(B * MAX_NODES)
    base = LEAF_INDEX + 2 * (rows % MAX_NODES)
    cols = np.arange(PAD)
    m0 = (cols[None, :] == base[:, None]).astype(np.float32)
    m1 = (cols[None, :] == (base + 1)[:, None]).astype(np.float32)
    return jnp.asarray(m0), jnp.asarray(m1)


# ---------------- ForwardTreeModel.forward ----------------
def forward(params, x):
    B = x.shape[0]
    stages = x[:, -1, 0]
    x_flat, a_bd, pool = _states_to_dense(x)
    m0, m1 = _leaf_placement(B)

    # active node (Tree.find_active) and its attributes for threshold/operator heads
    k_active = jnp.argmax(x[:, :MAX_NODES, ATTR_ACTIVE], axis=1)
    r = jnp.arange(B)
    feat_sel = x[r, k_active, ATTR_FEATURE]
    thr_sel = x[r, k_active, ATTR_THRESHOLD]
    extra = jnp.stack([feat_sel, thr_sel], axis=1)                       # (B, 2)
    c0 = (OPERATOR_INDEX + 2 * k_active).astype(jnp.int32)[:, None]      # (B, 1)
    stage_col = stages[:, None].astype(jnp.float32)                      # (B, 1)

    args = (x_flat, a_bd, pool, m0, m1, extra, c0, stage_col) + _fuse_params(params)
    out_pad = pl.pallas_call(
        _fused_forward_kernel,
        out_shape=jax.ShapeDtypeStruct((B, PAD), jnp.float32),
        in_specs=[pl.BlockSpec(memory_space=pltpu.MemorySpace.VMEM)] * len(args),
        out_specs=pl.BlockSpec(memory_space=pltpu.MemorySpace.VMEM),
    )(*args)
    return out_pad[:, :POLICY_OUTPUT_DIM]


# ---------------- pure-JAX reference (for correctness check) ----------------
def forward_reference(params, x):
    B = x.shape[0]
    stages = x[:, -1, 0]
    nodes = x[:, :MAX_NODES, :]
    node_mask = nodes[:, :, ATTR_TYPE] >= 0.0
    maskf = node_mask.astype(jnp.float32)
    feats = nodes * maskf[:, :, None]
    A = TREE_EDGES[None] * (maskf[:, :, None] * maskf[:, None, :])
    A_hat = A + maskf[:, :, None] * jnp.eye(MAX_NODES, dtype=jnp.float32)[None]
    deg = A_hat.sum(-1)
    dinv = jnp.where(deg > 0, 1.0 / jnp.sqrt(deg), 0.0)
    a_norm = dinv[:, :, None] * A_hat * dinv[:, None, :]

    def gcn(h, w, b, act):
        z = jnp.einsum('gnm,gmf->gnf', a_norm, h @ w) + b
        return jnp.where(z > 0, z, NEG_SLOPE * z) if act else z

    h = feats
    for w, b in zip(params["bb_w"], params["bb_b"]):
        h = gcn(h, w, b, True)
    pooled_bb = jnp.einsum('gn,gnf->gf', maskf, h)

    h_leaf = gcn(h, params["leaf_body_w"], params["leaf_body_b"], True)
    leaf_logits = gcn(h_leaf, params["leaf_out_w"], params["leaf_out_b"], False)
    y_leaf = jnp.where(node_mask[:, :, None], leaf_logits, jnp.nan).reshape(B, 2 * MAX_NODES)
    pooled_leaf = jnp.einsum('gn,gnf->gf', maskf, h_leaf)
    y_eos = pooled_leaf @ params["eos_w"] + params["eos_b"]

    def mlp(xin, w1, b1, w2, b2):
        hh = xin @ w1 + b1
        hh = jnp.where(hh > 0, hh, NEG_SLOPE * hh)
        return hh @ w2 + b2

    y_feat = mlp(pooled_bb, params["feat_w1"], params["feat_b1"],
                 params["feat_w2"], params["feat_b2"])
    k_active = jnp.argmax(x[:, :MAX_NODES, ATTR_ACTIVE], axis=1)
    r = jnp.arange(B)
    feat_sel = x[r, k_active, ATTR_FEATURE]
    thr_sel = x[r, k_active, ATTR_THRESHOLD]
    y_th = mlp(jnp.concatenate([pooled_bb, feat_sel[:, None]], 1),
               params["th_w1"], params["th_b1"], params["th_w2"], params["th_b2"])
    y_op = mlp(jnp.concatenate([pooled_bb, feat_sel[:, None], thr_sel[:, None]], 1),
               params["op_w1"], params["op_b1"], params["op_w2"], params["op_b2"])

    nan_row = jnp.full((B, POLICY_OUTPUT_DIM), jnp.nan, jnp.float32)
    row_complete = nan_row.at[:, LEAF_INDEX:FEATURE_INDEX].set(y_leaf)
    row_complete = row_complete.at[:, EOS_INDEX].set(y_eos[:, 0])
    row_leaf = nan_row.at[:, FEATURE_INDEX:THRESHOLD_INDEX].set(y_feat)
    row_feature = nan_row.at[:, THRESHOLD_INDEX:OPERATOR_INDEX].set(y_th)
    cols = jnp.arange(POLICY_OUTPUT_DIM)[None, :]
    c0 = (OPERATOR_INDEX + 2 * k_active)[:, None]
    row_threshold = jnp.where(cols == c0, y_op[:, 0:1],
                    jnp.where(cols == c0 + 1, y_op[:, 1:2], jnp.nan))
    s = stages[:, None]
    return jnp.where(s == STAGE_COMPLETE, row_complete,
           jnp.where(s == STAGE_LEAF, row_leaf,
           jnp.where(s == STAGE_FEATURE, row_feature, row_threshold)))


# ---------------- run ----------------
if __name__ == "__main__":
    key = jax.random.PRNGKey(0)
    k_states, k_params = jax.random.split(key)

    B = 4  # one sample in each stage: COMPLETE, LEAF, FEATURE, THRESHOLD
    n_nodes = jnp.array([3, 5, 7, 7])
    node_idx = jnp.arange(MAX_NODES)
    exists = node_idx[None, :] < n_nodes[:, None]

    k1, k2 = jax.random.split(k_states)
    feat_attr = jax.random.randint(k1, (B, MAX_NODES), 0, N_FEATURES).astype(jnp.float32)
    thr_attr = jax.random.uniform(k2, (B, MAX_NODES), jnp.float32)
    type_attr = jnp.where(exists, 0.0, -1.0)
    active = (node_idx[None, :] == 1).astype(jnp.float32) * exists

    nodes = jnp.stack(
        [type_attr,
         jnp.where(exists, feat_attr, 0.0),
         jnp.where(exists, thr_attr, 0.0),
         active],
        axis=-1,
    )                                                           # (B, N, 4)
    stage_row = jnp.zeros((B, 1, NODE_DIM), jnp.float32)
    stage_row = stage_row.at[:, 0, 0].set(jnp.array([0.0, 1.0, 2.0, 3.0]))
    states = jnp.concatenate([nodes, stage_row], axis=1)        # (B, MAX_NODES+1, 4)

    params = init_params(k_params)
    out = jax.jit(forward)(params, states)
    jax.block_until_ready(out)
    assert out.shape == (B, POLICY_OUTPUT_DIM)
    assert out.dtype == jnp.float32

    ref = forward_reference(params, states)
    np.testing.assert_allclose(np.asarray(out), np.asarray(ref), rtol=1e-3, atol=1e-3)
    print("KERNEL_OK")
</pallas_src>

<mosaic_0001>
module attributes {stable_mosaic.version = 11 : i64} {
  func.func @_fused_forward_kernel(%arg0: memref<32x4xf32, #tpu.memory_space<vmem>>, %arg1: memref<32x32xf32, #tpu.memory_space<vmem>>, %arg2: memref<4x32xf32, #tpu.memory_space<vmem>>, %arg3: memref<32x128xf32, #tpu.memory_space<vmem>>, %arg4: memref<32x128xf32, #tpu.memory_space<vmem>>, %arg5: memref<4x2xf32, #tpu.memory_space<vmem>>, %arg6: memref<4x1xi32, #tpu.memory_space<vmem>>, %arg7: memref<4x1xf32, #tpu.memory_space<vmem>>, %arg8: memref<4x32xf32, #tpu.memory_space<vmem>>, %arg9: memref<1x32xf32, #tpu.memory_space<vmem>>, %arg10: memref<32x32xf32, #tpu.memory_space<vmem>>, %arg11: memref<1x32xf32, #tpu.memory_space<vmem>>, %arg12: memref<32x32xf32, #tpu.memory_space<vmem>>, %arg13: memref<1x32xf32, #tpu.memory_space<vmem>>, %arg14: memref<32x32xf32, #tpu.memory_space<vmem>>, %arg15: memref<1x32xf32, #tpu.memory_space<vmem>>, %arg16: memref<32x2xf32, #tpu.memory_space<vmem>>, %arg17: memref<1x2xf32, #tpu.memory_space<vmem>>, %arg18: memref<32x128xf32, #tpu.memory_space<vmem>>, %arg19: memref<1x128xf32, #tpu.memory_space<vmem>>, %arg20: memref<32x96xf32, #tpu.memory_space<vmem>>, %arg21: memref<2x96xf32, #tpu.memory_space<vmem>>, %arg22: memref<1x96xf32, #tpu.memory_space<vmem>>, %arg23: memref<96x128xf32, #tpu.memory_space<vmem>>, %arg24: memref<1x128xf32, #tpu.memory_space<vmem>>, %arg25: memref<4x128xf32, #tpu.memory_space<vmem>>) attributes {dimension_semantics = [], scalar_prefetch = 0 : i64, scratch_operands = 0 : i64, tpu.core_type = #tpu.core_type<tc>} {
    %c0 = arith.constant 0 : index
    %c0_0 = arith.constant 0 : index
    %0 = vector.load %arg1[%c0, %c0_0] : memref<32x32xf32, #tpu.memory_space<vmem>>, vector<32x32xf32>
    %c0_1 = arith.constant 0 : index
    %c0_2 = arith.constant 0 : index
    %1 = vector.load %arg2[%c0_1, %c0_2] : memref<4x32xf32, #tpu.memory_space<vmem>>, vector<4x32xf32>
    %c0_3 = arith.constant 0 : index
    %c0_4 = arith.constant 0 : index
    %2 = vector.load %arg0[%c0_3, %c0_4] : memref<32x4xf32, #tpu.memory_space<vmem>>, vector<32x4xf32>
    %c0_5 = arith.constant 0 : index
    %c0_6 = arith.constant 0 : index
    %3 = vector.load %arg8[%c0_5, %c0_6] : memref<4x32xf32, #tpu.memory_space<vmem>>, vector<4x32xf32>
    %c0_7 = arith.constant 0 : index
    %c0_8 = arith.constant 0 : index
    %4 = vector.load %arg9[%c0_7, %c0_8] : memref<1x32xf32, #tpu.memory_space<vmem>>, vector<1x32xf32>
    %cst = arith.constant dense<0.000000e+00> : vector<32x32xf32>
    %5 = tpu.matmul %2, %3, %cst {dimension_numbers = #tpu.dot_dimension_numbers<[1], [0], [0], [1], [0, 0, 1, 1], [], []>} : vector<32x4xf32>, vector<4x32xf32>, vector<32x32xf32> -> vector<32x32xf32>
    %cst_9 = arith.constant dense<0.000000e+00> : vector<32x32xf32>
    %6 = tpu.matmul %0, %5, %cst_9 {dimension_numbers = #tpu.dot_dimension_numbers<[1], [0], [0], [1], [0, 0, 1, 1], [], []>} : vector<32x32xf32>, vector<32x32xf32>, vector<32x32xf32> -> vector<32x32xf32>
    %7 = vector.broadcast %4 : vector<1x32xf32> to vector<32x32xf32>
    %8 = arith.addf %6, %7 : vector<32x32xf32>
    %cst_10 = arith.constant 0.000000e+00 : f32
    %9 = vector.broadcast %cst_10 : f32 to vector<32x32xf32>
    %10 = arith.cmpf ogt, %8, %9 : vector<32x32xf32>
    %cst_11 = arith.constant 0.00999999977 : f32
    %11 = vector.broadcast %cst_11 : f32 to vector<32x32xf32>
    %12 = arith.mulf %11, %8 : vector<32x32xf32>
    %13 = arith.select %10, %8, %12 : vector<32x32xi1>, vector<32x32xf32>
    %c0_12 = arith.constant 0 : index
    %c0_13 = arith.constant 0 : index
    %14 = vector.load %arg10[%c0_12, %c0_13] : memref<32x32xf32, #tpu.memory_space<vmem>>, vector<32x32xf32>
    %c0_14 = arith.constant 0 : index
    %c0_15 = arith.constant 0 : index
    %15 = vector.load %arg11[%c0_14, %c0_15] : memref<1x32xf32, #tpu.memory_space<vmem>>, vector<1x32xf32>
    %cst_16 = arith.constant dense<0.000000e+00> : vector<32x32xf32>
    %16 = tpu.matmul %13, %14, %cst_16 {dimension_numbers = #tpu.dot_dimension_numbers<[1], [0], [0], [1], [0, 0, 1, 1], [], []>} : vector<32x32xf32>, vector<32x32xf32>, vector<32x32xf32> -> vector<32x32xf32>
    %cst_17 = arith.constant dense<0.000000e+00> : vector<32x32xf32>
    %17 = tpu.matmul %0, %16, %cst_17 {dimension_numbers = #tpu.dot_dimension_numbers<[1], [0], [0], [1], [0, 0, 1, 1], [], []>} : vector<32x32xf32>, vector<32x32xf32>, vector<32x32xf32> -> vector<32x32xf32>
    %18 = vector.broadcast %15 : vector<1x32xf32> to vector<32x32xf32>
    %19 = arith.addf %17, %18 : vector<32x32xf32>
    %cst_18 = arith.constant 0.000000e+00 : f32
    %20 = vector.broadcast %cst_18 : f32 to vector<32x32xf32>
    %21 = arith.cmpf ogt, %19, %20 : vector<32x32xf32>
    %cst_19 = arith.constant 0.00999999977 : f32
    %22 = vector.broadcast %cst_19 : f32 to vector<32x32xf32>
    %23 = arith.mulf %22, %19 : vector<32x32xf32>
    %24 = arith.select %21, %19, %23 : vector<32x32xi1>, vector<32x32xf32>
    %c0_20 = arith.constant 0 : index
    %c0_21 = arith.constant 0 : index
    %25 = vector.load %arg12[%c0_20, %c0_21] : memref<32x32xf32, #tpu.memory_space<vmem>>, vector<32x32xf32>
    %c0_22 = arith.constant 0 : index
    %c0_23 = arith.constant 0 : index
    %26 = vector.load %arg13[%c0_22, %c0_23] : memref<1x32xf32, #tpu.memory_space<vmem>>, vector<1x32xf32>
    %cst_24 = arith.constant dense<0.000000e+00> : vector<32x32xf32>
    %27 = tpu.matmul %24, %25, %cst_24 {dimension_numbers = #tpu.dot_dimension_numbers<[1], [0], [0], [1], [0, 0, 1, 1], [], []>} : vector<32x32xf32>, vector<32x32xf32>, vector<32x32xf32> -> vector<32x32xf32>
    %cst_25 = arith.constant dense<0.000000e+00> : vector<32x32xf32>
    %28 = tpu.matmul %0, %27, %cst_25 {dimension_numbers = #tpu.dot_dimension_numbers<[1], [0], [0], [1], [0, 0, 1, 1], [], []>} : vector<32x32xf32>, vector<32x32xf32>, vector<32x32xf32> -> vector<32x32xf32>
    %29 = vector.broadcast %26 : vector<1x32xf32> to vector<32x32xf32>
    %30 = arith.addf %28, %29 : vector<32x32xf32>
    %cst_26 = arith.constant 0.000000e+00 : f32
    %31 = vector.broadcast %cst_26 : f32 to vector<32x32xf32>
    %32 = arith.cmpf ogt, %30, %31 : vector<32x32xf32>
    %cst_27 = arith.constant 0.00999999977 : f32
    %33 = vector.broadcast %cst_27 : f32 to vector<32x32xf32>
    %34 = arith.mulf %33, %30 : vector<32x32xf32>
    %35 = arith.select %32, %30, %34 : vector<32x32xi1>, vector<32x32xf32>
    %cst_28 = arith.constant dense<0.000000e+00> : vector<4x32xf32>
    %36 = tpu.matmul %1, %35, %cst_28 {dimension_numbers = #tpu.dot_dimension_numbers<[1], [0], [0], [1], [0, 0, 1, 1], [], []>} : vector<4x32xf32>, vector<32x32xf32>, vector<4x32xf32> -> vector<4x32xf32>
    %c0_29 = arith.constant 0 : index
    %c0_30 = arith.constant 0 : index
    %37 = vector.load %arg14[%c0_29, %c0_30] : memref<32x32xf32, #tpu.memory_space<vmem>>, vector<32x32xf32>
    %c0_31 = arith.constant 0 : index
    %c0_32 = arith.constant 0 : index
    %38 = vector.load %arg15[%c0_31, %c0_32] : memref<1x32xf32, #tpu.memory_space<vmem>>, vector<1x32xf32>
    %cst_33 = arith.constant dense<0.000000e+00> : vector<32x32xf32>
    %39 = tpu.matmul %35, %37, %cst_33 {dimension_numbers = #tpu.dot_dimension_numbers<[1], [0], [0], [1], [0, 0, 1, 1], [], []>} : vector<32x32xf32>, vector<32x32xf32>, vector<32x32xf32> -> vector<32x32xf32>
    %cst_34 = arith.constant dense<0.000000e+00> : vector<32x32xf32>
    %40 = tpu.matmul %0, %39, %cst_34 {dimension_numbers = #tpu.dot_dimension_numbers<[1], [0], [0], [1], [0, 0, 1, 1], [], []>} : vector<32x32xf32>, vector<32x32xf32>, vector<32x32xf32> -> vector<32x32xf32>
    %41 = vector.broadcast %38 : vector<1x32xf32> to vector<32x32xf32>
    %42 = arith.addf %40, %41 : vector<32x32xf32>
    %cst_35 = arith.constant 0.000000e+00 : f32
    %43 = vector.broadcast %cst_35 : f32 to vector<32x32xf32>
    %44 = arith.cmpf ogt, %42, %43 : vector<32x32xf32>
    %cst_36 = arith.constant 0.00999999977 : f32
    %45 = vector.broadcast %cst_36 : f32 to vector<32x32xf32>
    %46 = arith.mulf %45, %42 : vector<32x32xf32>
    %47 = arith.select %44, %42, %46 : vector<32x32xi1>, vector<32x32xf32>
    %c0_37 = arith.constant 0 : index
    %c0_38 = arith.constant 0 : index
    %48 = vector.load %arg16[%c0_37, %c0_38] : memref<32x2xf32, #tpu.memory_space<vmem>>, vector<32x2xf32>
    %c0_39 = arith.constant 0 : index
    %c0_40 = arith.constant 0 : index
    %49 = vector.load %arg17[%c0_39, %c0_40] : memref<1x2xf32, #tpu.memory_space<vmem>>, vector<1x2xf32>
    %cst_41 = arith.constant dense<0.000000e+00> : vector<32x2xf32>
    %50 = tpu.matmul %47, %48, %cst_41 {dimension_numbers = #tpu.dot_dimension_numbers<[1], [0], [0], [1], [0, 0, 1, 1], [], []>} : vector<32x32xf32>, vector<32x2xf32>, vector<32x2xf32> -> vector<32x2xf32>
    %cst_42 = arith.constant dense<0.000000e+00> : vector<32x2xf32>
    %51 = tpu.matmul %0, %50, %cst_42 {dimension_numbers = #tpu.dot_dimension_numbers<[1], [0], [0], [1], [0, 0, 1, 1], [], []>} : vector<32x32xf32>, vector<32x2xf32>, vector<32x2xf32> -> vector<32x2xf32>
    %52 = vector.broadcast %49 : vector<1x2xf32> to vector<32x2xf32>
    %53 = arith.addf %51, %52 : vector<32x2xf32>
    %cst_43 = arith.constant dense<0.000000e+00> : vector<4x32xf32>
    %54 = tpu.matmul %1, %47, %cst_43 {dimension_numbers = #tpu.dot_dimension_numbers<[1], [0], [0], [1], [0, 0, 1, 1], [], []>} : vector<4x32xf32>, vector<32x32xf32>, vector<4x32xf32> -> vector<4x32xf32>
    %55 = vector.extract_strided_slice %53 {offsets = [0, 0], sizes = [32, 1], strides = [1, 1]} : vector<32x2xf32> to vector<32x1xf32>
    %c0_44 = arith.constant 0 : index
    %c0_45 = arith.constant 0 : index
    %56 = vector.load %arg3[%c0_44, %c0_45] : memref<32x128xf32, #tpu.memory_space<vmem>>, vector<32x128xf32>
    %57 = vector.broadcast %55 : vector<32x1xf32> to vector<32x128xf32>
    %58 = arith.mulf %57, %56 : vector<32x128xf32>
    %59 = vector.extract_strided_slice %53 {offsets = [0, 1], sizes = [32, 1], strides = [1, 1]} : vector<32x2xf32> to vector<32x1xf32>
    %c0_46 = arith.constant 0 : index
    %c0_47 = arith.constant 0 : index
    %60 = vector.load %arg4[%c0_46, %c0_47] : memref<32x128xf32, #tpu.memory_space<vmem>>, vector<32x128xf32>
    %61 = vector.broadcast %59 : vector<32x1xf32> to vector<32x128xf32>
    %62 = arith.mulf %61, %60 : vector<32x128xf32>
    %63 = arith.addf %58, %62 : vector<32x128xf32>
    %cst_48 = arith.constant dense<0.000000e+00> : vector<4x128xf32>
    %64 = tpu.matmul %1, %63, %cst_48 {dimension_numbers = #tpu.dot_dimension_numbers<[1], [0], [0], [1], [0, 0, 1, 1], [], []>} : vector<4x32xf32>, vector<32x128xf32>, vector<4x128xf32> -> vector<4x128xf32>
    %c0_49 = arith.constant 0 : index
    %c0_50 = arith.constant 0 : index
    %65 = vector.load %arg3[%c0_49, %c0_50] : memref<32x128xf32, #tpu.memory_space<vmem>>, vector<32x128xf32>
    %c0_51 = arith.constant 0 : index
    %c0_52 = arith.constant 0 : index
    %66 = vector.load %arg4[%c0_51, %c0_52] : memref<32x128xf32, #tpu.memory_space<vmem>>, vector<32x128xf32>
    %67 = arith.addf %65, %66 : vector<32x128xf32>
    %cst_53 = arith.constant dense<0.000000e+00> : vector<4x128xf32>
    %68 = tpu.matmul %1, %67, %cst_53 {dimension_numbers = #tpu.dot_dimension_numbers<[1], [0], [0], [1], [0, 0, 1, 1], [], []>} : vector<4x32xf32>, vector<32x128xf32>, vector<4x128xf32> -> vector<4x128xf32>
    %c0_54 = arith.constant 0 : index
    %c0_55 = arith.constant 0 : index
    %69 = vector.load %arg18[%c0_54, %c0_55] : memref<32x128xf32, #tpu.memory_space<vmem>>, vector<32x128xf32>
    %cst_56 = arith.constant dense<0.000000e+00> : vector<4x128xf32>
    %70 = tpu.matmul %54, %69, %cst_56 {dimension_numbers = #tpu.dot_dimension_numbers<[1], [0], [0], [1], [0, 0, 1, 1], [], []>} : vector<4x32xf32>, vector<32x128xf32>, vector<4x128xf32> -> vector<4x128xf32>
    %c0_57 = arith.constant 0 : index
    %c0_58 = arith.constant 0 : index
    %71 = vector.load %arg19[%c0_57, %c0_58] : memref<1x128xf32, #tpu.memory_space<vmem>>, vector<1x128xf32>
    %72 = vector.broadcast %71 : vector<1x128xf32> to vector<4x128xf32>
    %73 = arith.addf %70, %72 : vector<4x128xf32>
    %c0_59 = arith.constant 0 : index
    %c0_60 = arith.constant 0 : index
    %74 = vector.load %arg5[%c0_59, %c0_60] : memref<4x2xf32, #tpu.memory_space<vmem>>, vector<4x2xf32>
    %c0_61 = arith.constant 0 : index
    %c0_62 = arith.constant 0 : index
    %75 = vector.load %arg20[%c0_61, %c0_62] : memref<32x96xf32, #tpu.memory_space<vmem>>, vector<32x96xf32>
    %cst_63 = arith.constant dense<0.000000e+00> : vector<4x96xf32>
    %76 = tpu.matmul %36, %75, %cst_63 {dimension_numbers = #tpu.dot_dimension_numbers<[1], [0], [0], [1], [0, 0, 1, 1], [], []>} : vector<4x32xf32>, vector<32x96xf32>, vector<4x96xf32> -> vector<4x96xf32>
    %77 = vector.extract_strided_slice %74 {offsets = [0, 0], sizes = [4, 1], strides = [1, 1]} : vector<4x2xf32> to vector<4x1xf32>
    %c0_64 = arith.constant 0 : index
    %c0_65 = arith.constant 0 : index
    %78 = vector.load %arg21[%c0_64, %c0_65] : memref<2x96xf32, #tpu.memory_space<vmem>>, vector<1x96xf32>
    %79 = vector.broadcast %77 : vector<4x1xf32> to vector<4x96xf32>
    %80 = vector.broadcast %78 : vector<1x96xf32> to vector<4x96xf32>
    %81 = arith.mulf %79, %80 : vector<4x96xf32>
    %82 = arith.addf %76, %81 : vector<4x96xf32>
    %83 = vector.extract_strided_slice %74 {offsets = [0, 1], sizes = [4, 1], strides = [1, 1]} : vector<4x2xf32> to vector<4x1xf32>
    %c1 = arith.constant 1 : index
    %c0_66 = arith.constant 0 : index
    %84 = vector.load %arg21[%c1, %c0_66] : memref<2x96xf32, #tpu.memory_space<vmem>>, vector<1x96xf32>
    %85 = vector.broadcast %83 : vector<4x1xf32> to vector<4x96xf32>
    %86 = vector.broadcast %84 : vector<1x96xf32> to vector<4x96xf32>
    %87 = arith.mulf %85, %86 : vector<4x96xf32>
    %88 = arith.addf %82, %87 : vector<4x96xf32>
    %c0_67 = arith.constant 0 : index
    %c0_68 = arith.constant 0 : index
    %89 = vector.load %arg22[%c0_67, %c0_68] : memref<1x96xf32, #tpu.memory_space<vmem>>, vector<1x96xf32>
    %90 = vector.broadcast %89 : vector<1x96xf32> to vector<4x96xf32>
    %91 = arith.addf %88, %90 : vector<4x96xf32>
    %cst_69 = arith.constant 0.000000e+00 : f32
    %92 = vector.broadcast %cst_69 : f32 to vector<4x96xf32>
    %93 = arith.cmpf ogt, %91, %92 : vector<4x96xf32>
    %cst_70 = arith.constant 0.00999999977 : f32
    %94 = vector.broadcast %cst_70 : f32 to vector<4x96xf32>
    %95 = arith.mulf %94, %91 : vector<4x96xf32>
    %96 = arith.select %93, %91, %95 : vector<4x96xi1>, vector<4x96xf32>
    %c0_71 = arith.constant 0 : index
    %c0_72 = arith.constant 0 : index
    %97 = vector.load %arg23[%c0_71, %c0_72] : memref<96x128xf32, #tpu.memory_space<vmem>>, vector<96x128xf32>
    %cst_73 = arith.constant dense<0.000000e+00> : vector<4x128xf32>
    %98 = tpu.matmul %96, %97, %cst_73 {dimension_numbers = #tpu.dot_dimension_numbers<[1], [0], [0], [1], [0, 0, 1, 1], [], []>} : vector<4x96xf32>, vector<96x128xf32>, vector<4x128xf32> -> vector<4x128xf32>
    %c0_74 = arith.constant 0 : index
    %c0_75 = arith.constant 0 : index
    %99 = vector.load %arg24[%c0_74, %c0_75] : memref<1x128xf32, #tpu.memory_space<vmem>>, vector<1x128xf32>
    %100 = vector.broadcast %99 : vector<1x128xf32> to vector<4x128xf32>
    %101 = arith.addf %98, %100 : vector<4x128xf32>
    %102 = vector.extract_strided_slice %101 {offsets = [0, 126], sizes = [4, 1], strides = [1, 1]} : vector<4x128xf32> to vector<4x1xf32>
    %103 = vector.extract_strided_slice %101 {offsets = [0, 127], sizes = [4, 1], strides = [1, 1]} : vector<4x128xf32> to vector<4x1xf32>
    %104 = tpu.iota {dimensions = array<i32: 1>} : vector<4x128xi32>
    %c0_76 = arith.constant 0 : index
    %c0_77 = arith.constant 0 : index
    %105 = vector.load %arg6[%c0_76, %c0_77] : memref<4x1xi32, #tpu.memory_space<vmem>>, vector<4x1xi32>
    %c0_78 = arith.constant 0 : index
    %c0_79 = arith.constant 0 : index
    %106 = vector.load %arg7[%c0_78, %c0_79] : memref<4x1xf32, #tpu.memory_space<vmem>>, vector<4x1xf32>
    %107 = arith.addf %64, %73 : vector<4x128xf32>
    %c42_i32 = arith.constant 42 : i32
    %108 = vector.broadcast %c42_i32 : i32 to vector<4x128xi32>
    %109 = arith.cmpi eq, %104, %108 : vector<4x128xi32>
    %110 = arith.extui %109 : vector<4x128xi1> to vector<4x128xi32>
    %111 = arith.sitofp %110 : vector<4x128xi32> to vector<4x128xf32>
    %112 = arith.addf %68, %111 : vector<4x128xf32>
    %c16_i32 = arith.constant 16 : i32
    %113 = vector.broadcast %c16_i32 : i32 to vector<4x128xi32>
    %114 = arith.cmpi sge, %104, %113 : vector<4x128xi32>
    %c21_i32 = arith.constant 21 : i32
    %115 = vector.broadcast %c21_i32 : i32 to vector<4x128xi32>
    %116 = arith.cmpi slt, %104, %115 : vector<4x128xi32>
    %117 = arith.andi %114, %116 : vector<4x128xi1>
    %118 = arith.extui %117 : vector<4x128xi1> to vector<4x128xi32>
    %119 = arith.sitofp %118 : vector<4x128xi32> to vector<4x128xf32>
    %c21_i32_80 = arith.constant 21 : i32
    %120 = vector.broadcast %c21_i32_80 : i32 to vector<4x128xi32>
    %121 = arith.cmpi sge, %104, %120 : vector<4x128xi32>
    %c26_i32 = arith.constant 26 : i32
    %122 = vector.broadcast %c26_i32 : i32 to vector<4x128xi32>
    %123 = arith.cmpi slt, %104, %122 : vector<4x128xi32>
    %124 = arith.andi %121, %123 : vector<4x128xi1>
    %125 = arith.extui %124 : vector<4x128xi1> to vector<4x128xi32>
    %126 = arith.sitofp %125 : vector<4x128xi32> to vector<4x128xf32>
    %127 = vector.broadcast %105 : vector<4x1xi32> to vector<4x128xi32>
    %128 = arith.cmpi eq, %104, %127 : vector<4x128xi32>
    %cst_81 = arith.constant 0.000000e+00 : f32
    %129 = vector.shape_cast %102 : vector<4x1xf32> to vector<4x1xf32>
    %130 = vector.broadcast %129 : vector<4x1xf32> to vector<4x128xf32>
    %131 = vector.broadcast %cst_81 : f32 to vector<4x128xf32>
    %132 = arith.select %128, %130, %131 : vector<4x128xi1>, vector<4x128xf32>
    %c1_i32 = arith.constant 1 : i32
    %133 = vector.broadcast %c1_i32 : i32 to vector<4x1xi32>
    %134 = arith.addi %105, %133 : vector<4x1xi32>
    %135 = vector.broadcast %134 : vector<4x1xi32> to vector<4x128xi32>
    %136 = arith.cmpi eq, %104, %135 : vector<4x128xi32>
    %cst_82 = arith.constant 0.000000e+00 : f32
    %137 = vector.shape_cast %103 : vector<4x1xf32> to vector<4x1xf32>
    %138 = vector.broadcast %137 : vector<4x1xf32> to vector<4x128xf32>
    %139 = vector.broadcast %cst_82 : f32 to vector<4x128xf32>
    %140 = arith.select %136, %138, %139 : vector<4x128xi1>, vector<4x128xf32>
    %141 = arith.addf %132, %140 : vector<4x128xf32>
    %142 = vector.broadcast %105 : vector<4x1xi32> to vector<4x128xi32>
    %143 = arith.cmpi eq, %104, %142 : vector<4x128xi32>
    %c1_i32_83 = arith.constant 1 : i32
    %144 = vector.broadcast %c1_i32_83 : i32 to vector<4x1xi32>
    %145 = arith.addi %105, %144 : vector<4x1xi32>
    %146 = vector.broadcast %145 : vector<4x1xi32> to vector<4x128xi32>
    %147 = arith.cmpi eq, %104, %146 : vector<4x128xi32>
    %148 = arith.ori %143, %147 : vector<4x128xi1>
    %149 = arith.extui %148 : vector<4x128xi1> to vector<4x128xi32>
    %150 = arith.sitofp %149 : vector<4x128xi32> to vector<4x128xf32>
    %cst_84 = arith.constant 0.000000e+00 : f32
    %151 = vector.broadcast %cst_84 : f32 to vector<4x1xf32>
    %152 = arith.cmpf oeq, %106, %151 : vector<4x1xf32>
    %cst_85 = arith.constant 1.000000e+00 : f32
    %153 = vector.broadcast %cst_85 : f32 to vector<4x1xf32>
    %154 = arith.cmpf oeq, %106, %153 : vector<4x1xf32>
    %cst_86 = arith.constant 2.000000e+00 : f32
    %155 = vector.broadcast %cst_86 : f32 to vector<4x1xf32>
    %156 = arith.cmpf oeq, %106, %155 : vector<4x1xf32>
    %157 = vector.shape_cast %156 : vector<4x1xi1> to vector<4x1xi1>
    %158 = vector.broadcast %157 : vector<4x1xi1> to vector<4x128xi1>
    %159 = arith.select %158, %101, %141 : vector<4x128xi1>, vector<4x128xf32>
    %160 = vector.shape_cast %154 : vector<4x1xi1> to vector<4x1xi1>
    %161 = vector.broadcast %160 : vector<4x1xi1> to vector<4x128xi1>
    %162 = arith.select %161, %101, %159 : vector<4x128xi1>, vector<4x128xf32>
    %163 = vector.shape_cast %152 : vector<4x1xi1> to vector<4x1xi1>
    %164 = vector.broadcast %163 : vector<4x1xi1> to vector<4x128xi1>
    %165 = arith.select %164, %107, %162 : vector<4x128xi1>, vector<4x128xf32>
    %cst_87 = arith.constant 0.000000e+00 : f32
    %166 = vector.broadcast %cst_87 : f32 to vector<4x1xf32>
    %167 = arith.cmpf oeq, %106, %166 : vector<4x1xf32>
    %cst_88 = arith.constant 1.000000e+00 : f32
    %168 = vector.broadcast %cst_88 : f32 to vector<4x1xf32>
    %169 = arith.cmpf oeq, %106, %168 : vector<4x1xf32>
    %cst_89 = arith.constant 2.000000e+00 : f32
    %170 = vector.broadcast %cst_89 : f32 to vector<4x1xf32>
    %171 = arith.cmpf oeq, %106, %170 : vector<4x1xf32>
    %172 = vector.shape_cast %171 : vector<4x1xi1> to vector<4x1xi1>
    %173 = vector.broadcast %172 : vector<4x1xi1> to vector<4x128xi1>
    %174 = arith.select %173, %126, %150 : vector<4x128xi1>, vector<4x128xf32>
    %175 = vector.shape_cast %169 : vector<4x1xi1> to vector<4x1xi1>
    %176 = vector.broadcast %175 : vector<4x1xi1> to vector<4x128xi1>
    %177 = arith.select %176, %119, %174 : vector<4x128xi1>, vector<4x128xf32>
    %178 = vector.shape_cast %167 : vector<4x1xi1> to vector<4x1xi1>
    %179 = vector.broadcast %178 : vector<4x1xi1> to vector<4x128xi1>
    %180 = arith.select %179, %112, %177 : vector<4x128xi1>, vector<4x128xf32>
    %cst_90 = arith.constant 5.000000e-01 : f32
    %181 = vector.broadcast %cst_90 : f32 to vector<4x128xf32>
    %182 = arith.cmpf ogt, %180, %181 : vector<4x128xf32>
    %cst_91 = arith.constant 0x7FC00000 : f32
    %183 = vector.broadcast %cst_91 : f32 to vector<4x128xf32>
    %184 = arith.select %182, %165, %183 : vector<4x128xi1>, vector<4x128xf32>
    %c0_92 = arith.constant 0 : index
    %c0_93 = arith.constant 0 : index
    %185 = vector.load %arg25[%c0_92, %c0_93] : memref<4x128xf32, #tpu.memory_space<vmem>>, vector<4x128xf32>
    tpu.vector_store %arg25[%c0_92, %c0_93], %184 {strides = array<i32>} : memref<4x128xf32, #tpu.memory_space<vmem>>, vector<4x128xf32>,
    return
  }
}

</mosaic_0001>

<bundles_post_ra>
// kernel: forward.1
= control target key start
LH: loop header
LB: loop body
LE: loop exit
PB: predicated region body
PF: predicated region fallthrough
CT: control target
= control target key end

     0   :  { %s1444_s0 = inlined_call_operand.vmem [shape: f32[32,4], index: 0, kind: input, shape index: {}]   ;;  %s1445_s1 = inlined_call_operand.vmem [shape: f32[32,32], index: 1, kind: input, shape index: {}]   ;;  %s1446_s2 = inlined_call_operand.vmem [shape: f32[4,32], index: 2, kind: input, shape index: {}]   ;;  %s1447_s3 = inlined_call_operand.vmem [shape: f32[32,128], index: 3, kind: input, shape index: {}]   ;;  %s1448_s4 = inlined_call_operand.vmem [shape: f32[32,128], index: 4, kind: input, shape index: {}]   ;;  %s1449_s5 = inlined_call_operand.vmem [shape: f32[4,2], index: 5, kind: input, shape index: {}]   ;;  %s1450_s6 = inlined_call_operand.vmem [shape: s32[4,1], index: 6, kind: input, shape index: {}]   ;;  %s1451_s7 = inlined_call_operand.vmem [shape: f32[4,1], index: 7, kind: input, shape index: {}]   ;;  %s1452_s8 = inlined_call_operand.vmem [shape: f32[4,32], index: 8, kind: input, shape index: {}]   ;;  %s1453_s9 = inlined_call_operand.vmem [shape: f32[1,32], index: 9, kind: input, shape index: {}]   ;;  %s1454_s10 = inlined_call_operand.vmem [shape: f32[32,32], index: 10, kind: input, shape index: {}]   ;;  %s1455_s11 = inlined_call_operand.vmem [shape: f32[1,32], index: 11, kind: input, shape index: {}]   ;;  %s1456_s12 = inlined_call_operand.vmem [shape: f32[32,32], index: 12, kind: input, shape index: {}]   ;;  %s1457_s13 = inlined_call_operand.vmem [shape: f32[1,32], index: 13, kind: input, shape index: {}]   ;;  %s1458_s14 = inlined_call_operand.vmem [shape: f32[32,32], index: 14, kind: input, shape index: {}]   ;;  %s1459_s15 = inlined_call_operand.vmem [shape: f32[1,32], index: 15, kind: input, shape index: {}]   ;;  %s1460_s16 = inlined_call_operand.vmem [shape: f32[32,2], index: 16, kind: input, shape index: {}]   ;;  %s1461_s17 = inlined_call_operand.vmem [shape: f32[1,2], index: 17, kind: input, shape index: {}]   ;;  %s1462_s18 = inlined_call_operand.vmem [shape: f32[32,128], index: 18, kind: input, shape index: {}]   ;;  %s1463_s19 = inlined_call_operand.vmem [shape: f32[1,128], index: 19, kind: input, shape index: {}]   ;;  %s1464_s20 = inlined_call_operand.vmem [shape: f32[32,96], index: 20, kind: input, shape index: {}]   ;;  %s1465_s21 = inlined_call_operand.vmem [shape: f32[2,96], index: 21, kind: input, shape index: {}]   ;;  %s1466_s22 = inlined_call_operand.vmem [shape: f32[1,96], index: 22, kind: input, shape index: {}]   ;;  %s1467_s23 = inlined_call_operand.vmem [shape: f32[96,128], index: 23, kind: input, shape index: {}]   ;;  %s1468_s24 = inlined_call_operand.vmem [shape: f32[1,128], index: 24, kind: input, shape index: {}]   ;;  %s1469_s25 = inlined_call_operand.hbm [shape: f32[4,128], index: 25, kind: output, shape index: {}]  }
   0x1   :  { %1474 = sst [smem:[#allocation5_spill]] %s1444_s0 }
   0x2   :  { %1475 = sst [smem:[#allocation6_spill]] %s1445_s1 }
   0x3   :  { %1476 = sst [smem:[#allocation7_spill]] %s1446_s2 }
   0x4   :  { %1477 = sst [smem:[#allocation8_spill]] %s1447_s3 }
   0x5   :  { %1478 = sst [smem:[#allocation9_spill]] %s1448_s4 }
   0x6   :  { %1479 = sst [smem:[#allocation10_spill]] %s1449_s5 }
   0x7   :  { %1480 = sst [smem:[#allocation11_spill]] %s1450_s6 }
   0x8   :  { %1481 = sst [smem:[#allocation12_spill]] %s1451_s7 }
   0x9   :  { %1482 = sst [smem:[#allocation13_spill]] %s1452_s8 }
   0xa   :  { %1483 = sst [smem:[#allocation14_spill]] %s1453_s9 }
   0xb   :  { %s1484_s6 = sld [smem:[#allocation13_spill]]  ;;  %vm105_vm0 = vcmask 1043456   ;;  %vm92_vm1 = vcmask 31744  }
   0xc   :  { %s1485_s3 = sld [smem:[#allocation5_spill]] }
  0x11   :  { %v90_v0 = vld [vmem:[%s1484_s6] sm:$0xf] }
  0x12   :  { %v86_v1 = vld [vmem:[%s1485_s3] sm:$0xff]  ;;  %893 = vmatpush.msk.msra.mxu0 %vm105_vm0, %v90_v0 }
  0x13   :  { %894 = vmatmul.msk.f32.vlgmr.msra.gmra.mxu0 %vm92_vm1, %v86_v1 }
  0x14   :  { %30 = vsyncpa [#allocation3], 0  ;;  %v87_v2 = vld [vmem:[%s1485_s3 + $0x8] sm:$0xff]  ;;  %v88_v3 = vld [vmem:[%s1485_s3 + $0x10] sm:$0xff]  ;;  %s1486_s2 = sld [smem:[#allocation6_spill]]  ;;  %vm141_vm2 = vcmask 261120  }
  0x15   :  { %v89_v4 = vld [vmem:[%s1485_s3 + $0x18] sm:$0xff]  ;;  %v197_v14 = vld [vmem:[%s1454_s10 + $0x10] sm:$0xff]  ;;  %v196_v15 = vld [vmem:[%s1454_s10 + $0x8] sm:$0xff]  ;;  %s1488_s30 = sld [smem:[#allocation7_spill]]  ;;  %s1009_s9 = smov [#allocation2]  }
  0x16   :  { %v198_v9 = vld [vmem:[%s1454_s10 + $0x18] sm:$0xff]  ;;  %v195_v16 = vld [vmem:[%s1454_s10] sm:$0xff]  ;;  %v287_v39 = vld [vmem:[%s1456_s12 + $0x10] sm:$0xff]  ;;  %s1489_s5 = sld [smem:[#allocation10_spill]] }
  0x17   :  { %224 = vmatpush.msra.mxu2 %v198_v9  ;;  %v288_v38 = vld [vmem:[%s1456_s12 + $0x18] sm:$0xff]  ;;  %v286_v40 = vld [vmem:[%s1456_s12 + $0x8] sm:$0xff]  ;;  %v285_v41 = vld [vmem:[%s1456_s12] sm:$0xff]  ;;  %s1493_s26 = sld [smem:[#allocation9_spill]] }
  0x18   :  { %314 = vmatpush.msrb.mxu0 %v288_v38  ;;  %v969_v42 = vld [vmem:[%s1455_s11] ss:$0 sm:$0xff]  ;;  %v401_v63 = vld [vmem:[%s1458_s14 + $0x18] sm:$0xff]  ;;  %v400_v0 = vld [vmem:[%s1458_s14 + $0x10] sm:$0xff] }
  0x19   :  { %225 = vmatpush.msra.mxu2 %v197_v14  ;;  %v399_v1 = vld [vmem:[%s1458_s14 + $0x8] sm:$0xff] }
  0x1a   :  { %v1161_v10 = vld [vmem:[%s1486_s2] sm:$0xff]  ;;  %v1168_v11 = vld [vmem:[%s1486_s2 + $0x8] sm:$0xff]  ;;  %v1175_v12 = vld [vmem:[%s1486_s2 + $0x10] sm:$0xff]  ;;  %315 = vmatpush.msrb.mxu0 %v287_v39 }
  0x1b   :  { %895 = vmatmul.msk.f32.gmra.mxu0 %vm92_vm1, %v87_v2  ;;  %v1182_v13 = vld [vmem:[%s1486_s2 + $0x18] sm:$0xff]  ;;  %226 = vmatpush.msra.mxu2 %v196_v15  ;;  %s1487_s2 = sld [smem:[#allocation14_spill]]  ;;  %v398_v2 = vld [vmem:[%s1458_s14] sm:$0xff] }
  0x1c   :  { %316 = vmatpush.msrb.mxu0 %v286_v40 }
  0x1d   :  { %227 = vmatpush.msra.mxu2 %v195_v16 }
  0x1e   :  { %317 = vmatpush.msrb.mxu0 %v285_v41 }
  0x21   :  { %v968_v17 = vld [vmem:[%s1487_s2] ss:$0 sm:$0xff]  ;;  %s1491_s2 = sld [smem:[#allocation12_spill]] }
  0x23   :  { %896 = vmatmul.msk.f32.gmra.mxu0 %vm92_vm1, %v88_v3  ;;  %v970_v3 = vld [vmem:[%s1457_s13] ss:$0 sm:$0xff]  ;;  %s1492_s13 = sld [smem:[#allocation8_spill]] }
  0x2b   :  { %897 = vmatmul.msk.f32.gmra.mxu0 %vm92_vm1, %v89_v4 }
  0x90   :  { %v126_v5 = vpop.f32.mrf.mxu0 }
  0x98   :  { %v129_v6 = vpop.f32.mrf.mxu0 }
  0xa0   :  { %v132_v7 = vpop.f32.mrf.mxu0 }
  0xa8   :  { %v135_v8 = vpop.f32.mrf.mxu0 }
  0xa9   :  { %166 = vmatpush.msra.mxu1 %v135_v8 }
  0xab   :  { %167 = vmatpush.msra.mxu1 %v132_v7 }
  0xad   :  { %168 = vmatpush.msra.mxu1 %v129_v6 }
  0xaf   :  { %169 = vmatpush.msra.mxu1 %v126_v5 }
  0xb0   :  { %898 = vmatmul.msk.f32.vlgmr.msra.gmra.mxu1 %vm141_vm2, %v1161_v10 }
  0xb8   :  { %899 = vmatmul.msk.f32.gmra.mxu1 %vm141_vm2, %v1168_v11 }
  0xc0   :  { %900 = vmatmul.msk.f32.gmra.mxu1 %vm141_vm2, %v1175_v12 }
  0xc8   :  { %901 = vmatmul.msk.f32.gmra.mxu1 %vm141_vm2, %v1182_v13 }
 0x12d   :  { %v171_v18 = vpop.f32.mrf.mxu1 }
 0x12e   :  { %v172_v19 = vadd.f32 %v968_v17, %v171_v18 }
 0x130   :  { %v187_v20 = vmul.f32 0.01, %v172_v19  ;;  %vm183_vm3 = vcmp.gt.f32.partialorder %v172_v19, 0.0 }
 0x132   :  { %v191_v21 = vsel %vm183_vm3, %v172_v19, %v187_v20 }
 0x133   :  { %902 = vmatmul.msk.f32.vlgmr.msra.gmra.mxu2 %vm141_vm2, %v191_v21 }
 0x135   :  { %v174_v22 = vpop.f32.mrf.mxu1 }
 0x136   :  { %v175_v23 = vadd.f32 %v968_v17, %v174_v22 }
 0x138   :  { %v188_v24 = vmul.f32 0.01, %v175_v23  ;;  %vm184_vm4 = vcmp.gt.f32.partialorder %v175_v23, 0.0 }
 0x13a   :  { %v192_v25 = vsel %vm184_vm4, %v175_v23, %v188_v24  ;;  %v1259_v24 = vld [vmem:[%s1488_s30] sm:$0xf] }
 0x13b   :  { %903 = vmatmul.msk.f32.gmra.mxu2 %vm141_vm2, %v192_v25 }
 0x13d   :  { %v177_v26 = vpop.f32.mrf.mxu1 }
 0x13e   :  { %v178_v27 = vadd.f32 %v968_v17, %v177_v26 }
 0x140   :  { %v189_v28 = vmul.f32 0.01, %v178_v27  ;;  %vm185_vm5 = vcmp.gt.f32.partialorder %v178_v27, 0.0 }
 0x142   :  { %v193_v29 = vsel %vm185_vm5, %v178_v27, %v189_v28  ;;  %vm745_vm5 = vcmask 785408  }
 0x143   :  { %904 = vmatmul.msk.f32.gmra.mxu2 %vm141_vm2, %v193_v29  ;;  %v491_v29 = vld [vmem:[%s1460_s16 + $0x18] sm:$0xff] }
 0x144   :  { %517 = vmatpush.msra.mxu0 %v491_v29 }
 0x145   :  { %v180_v30 = vpop.f32.mrf.mxu1 }
 0x146   :  { %v181_v31 = vadd.f32 %v968_v17, %v180_v30  ;;  %v490_v30 = vld [vmem:[%s1460_s16 + $0x10] sm:$0xff] }
 0x147   :  { %518 = vmatpush.msra.mxu0 %v490_v30 }
 0x148   :  { %v190_v32 = vmul.f32 0.01, %v181_v31  ;;  %vm186_vm6 = vcmp.gt.f32.partialorder %v181_v31, 0.0 }
 0x14a   :  { %v194_v33 = vsel %vm186_vm6, %v181_v31, %v190_v32  ;;  %v489_v31 = vld [vmem:[%s1460_s16 + $0x8] sm:$0xff]  ;;  %v488_v32 = vld [vmem:[%s1460_s16] sm:$0xff] }
 0x14b   :  { %905 = vmatmul.msk.f32.gmra.mxu2 %vm141_vm2, %v194_v33  ;;  %519 = vmatpush.msra.mxu0 %v489_v31 }
 0x14d   :  { %520 = vmatpush.msra.mxu0 %v488_v32 }
 0x1b6   :  { %v229_v34 = vpop.f32.mrf.mxu2 }
 0x1be   :  { %v232_v35 = vpop.f32.mrf.mxu2 }
 0x1c6   :  { %v235_v36 = vpop.f32.mrf.mxu2 }
 0x1ce   :  { %v238_v37 = vpop.f32.mrf.mxu2 }
 0x1cf   :  { %256 = vmatpush.msra.mxu3 %v238_v37 }
 0x1d1   :  { %257 = vmatpush.msra.mxu3 %v235_v36 }
 0x1d3   :  { %258 = vmatpush.msra.mxu3 %v232_v35 }
 0x1d5   :  { %259 = vmatpush.msra.mxu3 %v229_v34  ;;  %v971_v34 = vld [vmem:[%s1459_s15] ss:$0 sm:$0xff]  ;;  %s1490_s15 = sld [smem:[#allocation11_spill]] }
 0x1d6   :  { %906 = vmatmul.msk.f32.vlgmr.msra.gmra.mxu3 %vm141_vm2, %v1161_v10 }
 0x1d7   :  { %427 = vmatpush.msrb.mxu3 %v401_v63  ;;  %v735_v63 = vld [vmem:[%s1467_s23 + $0x30] sm:$0xff] }
 0x1d9   :  { %428 = vmatpush.msrb.mxu3 %v400_v0  ;;  %v734_v0 = vld [vmem:[%s1467_s23 + $0x28] sm:$0xff] }
 0x1db   :  { %429 = vmatpush.msrb.mxu3 %v399_v1 }
 0x1dd   :  { %430 = vmatpush.msrb.mxu3 %v398_v2  ;;  %v733_v2 = vld [vmem:[%s1467_s23 + $0x20] sm:$0xff] }
 0x1de   :  { %907 = vmatmul.msk.f32.gmra.mxu3 %vm141_vm2, %v1168_v11 }
 0x1e6   :  { %908 = vmatmul.msk.f32.gmra.mxu3 %vm141_vm2, %v1175_v12 }
 0x1ee   :  { %909 = vmatmul.msk.f32.gmra.mxu3 %vm141_vm2, %v1182_v13 }
 0x259   :  { %v261_v43 = vpop.f32.mrf.mxu3 }
 0x25a   :  { %v262_v44 = vadd.f32 %v969_v42, %v261_v43  ;;  %v677_v43 = vld [vmem:[%s1489_s5] sm:$0xf] }
 0x25c   :  { %vm273_vm7 = vcmp.gt.f32.partialorder %v262_v44, 0.0  ;;  %v277_v45 = vmul.f32 0.01, %v262_v44 }
 0x25e   :  { %v281_v46 = vsel %vm273_vm7, %v262_v44, %v277_v45  ;;  %v1004_v44 = vmov 0  }
 0x25f   :  { %910 = vmatmul.msk.f32.vlgmr.msrb.gmra.mxu0 %vm141_vm2, %v281_v46  ;;  %955 = vset.pattern.permute.xlu0 %v1004_v44 }
 0x260   :  { %685 = vperm.xlu0 %955, %v677_v43   ;;  %957 = vset.pattern.permute.xlu1 %v1004_v44 }
 0x261   :  { %v264_v47 = vpop.f32.mrf.mxu3  ;;  %958 = vset.pattern.permute.xlu2 %v1004_v44 }
 0x262   :  { %v265_v48 = vadd.f32 %v969_v42, %v264_v47 }
 0x264   :  { %v278_v49 = vmul.f32 0.01, %v265_v48  ;;  %vm274_vm8 = vcmp.gt.f32.partialorder %v265_v48, 0.0 }
 0x266   :  { %v282_v50 = vsel %vm274_vm8, %v265_v48, %v278_v49  ;;  %v1005_v49 = vmov 1  }
 0x267   :  { %911 = vmatmul.msk.f32.gmra.mxu0 %vm141_vm2, %v282_v50 }
 0x268   :  { %956 = vset.pattern.permute.xlu0 %v1005_v49 }
 0x269   :  { %v267_v51 = vpop.f32.mrf.mxu3  ;;  %715 = vperm.xlu0 %956, %v677_v43  }
 0x26a   :  { %v268_v52 = vadd.f32 %v969_v42, %v267_v51 }
 0x26c   :  { %v279_v53 = vmul.f32 0.01, %v268_v52  ;;  %vm275_vm9 = vcmp.gt.f32.partialorder %v268_v52, 0.0 }
 0x26e   :  { %v283_v54 = vsel %vm275_vm9, %v268_v52, %v279_v53 }
 0x26f   :  { %912 = vmatmul.msk.f32.gmra.mxu0 %vm141_vm2, %v283_v54  ;;  %v681_v54 = vld [vmem:[%s1464_s20 + $0x18] sm:$0xff] }
 0x271   :  { %v270_v55 = vpop.f32.mrf.mxu3  ;;  %960 = vset.pattern.permute.xlu0 %v1004_v44 }
 0x272   :  { %v271_v56 = vadd.f32 %v969_v42, %v270_v55  ;;  %v680_v55 = vld [vmem:[%s1464_s20 + $0x10] sm:$0xff] }
 0x274   :  { %v280_v57 = vmul.f32 0.01, %v271_v56  ;;  %vm276_vm10 = vcmp.gt.f32.partialorder %v271_v56, 0.0 }
 0x276   :  { %v284_v58 = vsel %vm276_vm10, %v271_v56, %v280_v57  ;;  %v679_v56 = vld [vmem:[%s1464_s20 + $0x8] sm:$0xff]  ;;  %v678_v57 = vld [vmem:[%s1464_s20] sm:$0xff] }
 0x277   :  { %913 = vmatmul.msk.f32.gmra.mxu0 %vm141_vm2, %v284_v58  ;;  %v740_v58 = vld [vmem:[%s1467_s23 + $0x58] sm:$0xff] }
 0x278   :  { %753 = vmatpush.msrb.mxu0 %v740_v58  ;;  %v586_v58 = vld [vmem:[%s1492_s13] sm:$0xff] }
 0x2dc   :  { %v319_v59 = vpop.f32.mrf.mxu0 }
 0x2e4   :  { %v322_v60 = vpop.f32.mrf.mxu0 }
 0x2ec   :  { %v325_v61 = vpop.f32.mrf.mxu0 }
 0x2f4   :  { %v328_v62 = vpop.f32.mrf.mxu0 }
 0x2f5   :  { %346 = vmatpush.msrb.mxu1 %v328_v62  ;;  %v736_v62 = vld [vmem:[%s1467_s23 + $0x38] sm:$0xff] }
 0x2f7   :  { %347 = vmatpush.msrb.mxu1 %v325_v61  ;;  %v737_v61 = vld [vmem:[%s1467_s23 + $0x40] sm:$0xff] }
 0x2f9   :  { %348 = vmatpush.msrb.mxu1 %v322_v60  ;;  %v738_v60 = vld [vmem:[%s1467_s23 + $0x48] sm:$0xff] }
 0x2fb   :  { %349 = vmatpush.msrb.mxu1 %v319_v59  ;;  %v739_v59 = vld [vmem:[%s1467_s23 + $0x50] sm:$0xff] }
 0x2fc   :  { %914 = vmatmul.msk.f32.vlgmr.msrb.gmra.mxu1 %vm141_vm2, %v1161_v10  ;;  %754 = vmatpush.msrb.mxu0 %v739_v59  ;;  %v614_v59 = vld [vmem:[%s1493_s26] sm:$0xff] }
 0x2fe   :  { %755 = vmatpush.msrb.mxu0 %v738_v60  ;;  %v642_v60 = vadd.f32 %v614_v59, %v586_v58 }
 0x300   :  { %756 = vmatpush.msrb.mxu0 %v737_v61 }
 0x302   :  { %757 = vmatpush.msrb.mxu0 %v736_v62 }
 0x304   :  { %915 = vmatmul.msk.f32.gmra.mxu1 %vm141_vm2, %v1168_v11  ;;  %758 = vmatpush.msrb.mxu0 %v735_v63 }
 0x306   :  { %759 = vmatpush.msrb.mxu0 %v734_v0 }
 0x308   :  { %760 = vmatpush.msrb.mxu0 %v733_v2 }
 0x30c   :  { %916 = vmatmul.msk.f32.gmra.mxu1 %vm141_vm2, %v1175_v12 }
 0x314   :  { %917 = vmatmul.msk.f32.gmra.mxu1 %vm141_vm2, %v1182_v13 }
 0x379   :  { %v351_v4 = vpop.f32.mrf.mxu1 }
 0x37a   :  { %v352_v5 = vadd.f32 %v970_v3, %v351_v4  ;;  %v731_v4 = vld [vmem:[%s1467_s23 + $0x10] sm:$0xff] }
 0x37c   :  { %vm363_vm11 = vcmp.gt.f32.partialorder %v352_v5, 0.0  ;;  %v367_v6 = vmul.f32 0.01, %v352_v5 }
 0x37e   :  { %v371_v7 = vsel %vm363_vm11, %v352_v5, %v367_v6  ;;  %v730_v5 = vld [vmem:[%s1467_s23 + $0x8] sm:$0xff]  ;;  %v729_v6 = vld [vmem:[%s1467_s23] sm:$0xff] }
 0x37f   :  { %919 = vmatmul.msk.f32.vlgmr.msrb.gmra.mxu3 %vm141_vm2, %v371_v7 }
 0x381   :  { %v354_v8 = vpop.f32.mrf.mxu1 }
 0x382   :  { %v355_v9 = vadd.f32 %v970_v3, %v354_v8 }
 0x384   :  { %v368_v14 = vmul.f32 0.01, %v355_v9  ;;  %vm364_vm12 = vcmp.gt.f32.partialorder %v355_v9, 0.0 }
 0x386   :  { %v372_v15 = vsel %vm364_vm12, %v355_v9, %v368_v14  ;;  %v686_v9 = vpop.permute.xlu0 %685 }
 0x387   :  { %920 = vmatmul.msk.f32.gmra.mxu3 %vm141_vm2, %v372_v15 }
 0x389   :  { %v357_v16 = vpop.f32.mrf.mxu1 }
 0x38a   :  { %v358_v17 = vadd.f32 %v970_v3, %v357_v16  ;;  %v972_v16 = vld [vmem:[%s1465_s21] ss:$0 sm:$0xff] }
 0x38c   :  { %v369_v18 = vmul.f32 0.01, %v358_v17  ;;  %vm365_vm13 = vcmp.gt.f32.partialorder %v358_v17, 0.0 }
 0x38e   :  { %v373_v19 = vsel %vm365_vm13, %v358_v17, %v369_v18  ;;  %v973_v17 = vld [vmem:[%s1465_s21 + $0x1] ss:$0 sm:$0xff]  ;;  %v716_v18 = vpop.permute.xlu0 %715 }
 0x38f   :  { %921 = vmatmul.msk.f32.gmra.mxu3 %vm141_vm2, %v373_v19 }
 0x391   :  { %v360_v20 = vpop.f32.mrf.mxu1 }
 0x392   :  { %v361_v21 = vadd.f32 %v970_v3, %v360_v20  ;;  %v732_v3 = vld [vmem:[%s1467_s23 + $0x18] sm:$0xff]  ;;  %v719_v20 = vmul.f32 %v973_v17, %v716_v18 }
 0x393   :  { %761 = vmatpush.msrb.mxu0 %v732_v3 }
 0x394   :  { %vm366_vm14 = vcmp.gt.f32.partialorder %v361_v21, 0.0  ;;  %v370_v22 = vmul.f32 0.01, %v361_v21 }
 0x395   :  { %762 = vmatpush.msrb.mxu0 %v731_v4 }
 0x396   :  { %v374_v23 = vsel %vm366_vm14, %v361_v21, %v370_v22 }
 0x397   :  { %390 = vmatpush.msrb.mxu2 %v374_v23  ;;  %922 = vmatmul.msk.f32.gmra.mxu3 %vm141_vm2, %v374_v23  ;;  %v974_v23 = vld [vmem:[%s1466_s22] ss:$0 sm:$0xff] }
 0x398   :  { %763 = vmatpush.msrb.mxu0 %v730_v5 }
 0x399   :  { %391 = vmatpush.msrb.mxu2 %v373_v19  ;;  %v689_v19 = vmul.f32 %v972_v16, %v686_v9 }
 0x39a   :  { %764 = vmatpush.msrb.mxu0 %v729_v6 }
 0x39b   :  { %392 = vmatpush.msrb.mxu2 %v372_v15 }
 0x39d   :  { %393 = vmatpush.msrb.mxu2 %v371_v7 }
 0x39e   :  { %918 = vmatmul.msk.f32.vlgmr.msrb.gmra.mxu2 %vm141_vm2, %v1259_v24 }
 0x402   :  { %v432_v25 = vpop.f32.mrf.mxu3 }
 0x40a   :  { %v435_v26 = vpop.f32.mrf.mxu3 }
 0x412   :  { %v438_v27 = vpop.f32.mrf.mxu3 }
 0x41a   :  { %v441_v28 = vpop.f32.mrf.mxu3 }
 0x41b   :  { %459 = vmatpush.msra.mxu2 %v441_v28  ;;  %v649_v28 = vld [vmem:[%s1462_s18 + $0x18] sm:$0xff] }
 0x41d   :  { %460 = vmatpush.msra.mxu2 %v438_v27 }
 0x41f   :  { %461 = vmatpush.msra.mxu2 %v435_v26 }
 0x421   :  { %462 = vmatpush.msra.mxu2 %v432_v25  ;;  %v395_v33 = vpop.f32.mrf.mxu2 }
 0x422   :  { %923 = vmatmul.msk.f32.vlgmr.msra.gmra.mxu2 %vm141_vm2, %v1161_v10 }
 0x423   :  { %945 = vmatpush.msrb.mxu2 %v491_v29  ;;  %v975_v29 = vld [vmem:[%s1461_s17] ss:$0 sm:$0xff]  ;;  %s882_s17 = sshll.u32 %s1009_s9, 4  ;;  %s883_s17 = int_to_ptr.vmem [resolvable:$true] %s882_s17 }
 0x425   :  { %946 = vmatpush.msrb.mxu2 %v490_v30 }
 0x427   :  { %947 = vmatpush.msrb.mxu2 %v489_v31 }
 0x429   :  { %948 = vmatpush.msrb.mxu2 %v488_v32 }
 0x42a   :  { %924 = vmatmul.msk.f32.gmra.mxu2 %vm141_vm2, %v1168_v11 }
 0x42b   :  { %669 = vmatpush.msra.mxu2 %v649_v28 }
 0x432   :  { %925 = vmatmul.msk.f32.gmra.mxu2 %vm141_vm2, %v1175_v12 }
 0x43a   :  { %926 = vmatmul.msk.f32.gmra.mxu2 %vm141_vm2, %v1182_v13 }
 0x4a5   :  { %v464_v35 = vpop.f32.mrf.mxu2 }
 0x4a6   :  { %v465_v36 = vadd.f32 %v971_v34, %v464_v35  ;;  %v976_v35 = vld [vmem:[%s1468_s24] ss:$0 sm:$0xff]  ;;  %s884_s24 = sshll.u32 %s1469_s25, 4  ;;  %s885_s24 = int_to_ptr.hbm [resolvable:$true] %s884_s24 }
 0x4a8   :  { %vm476_vm15 = vcmp.gt.f32.partialorder %v465_v36, 0.0  ;;  %v480_v37 = vmul.f32 0.01, %v465_v36 }
 0x4aa   :  { %v484_v38 = vsel %vm476_vm15, %v465_v36, %v480_v37 }
 0x4ab   :  { %927 = vmatmul.msk.f32.vlgmr.msra.gmra.mxu0 %vm141_vm2, %v484_v38 }
 0x4ad   :  { %v467_v39 = vpop.f32.mrf.mxu2 }
 0x4ae   :  { %v468_v40 = vadd.f32 %v971_v34, %v467_v39 }
 0x4b0   :  { %v481_v41 = vmul.f32 0.01, %v468_v40  ;;  %vm477_vm0 = vcmp.gt.f32.partialorder %v468_v40, 0.0 }
 0x4b2   :  { %v485_v42 = vsel %vm477_vm0, %v468_v40, %v481_v41 }
 0x4b3   :  { %928 = vmatmul.msk.f32.gmra.mxu0 %vm141_vm2, %v485_v42 }
 0x4b5   :  { %v470_v45 = vpop.f32.mrf.mxu2 }
 0x4b6   :  { %v471_v46 = vadd.f32 %v971_v34, %v470_v45  ;;  %v772_v45 = vld [vmem:[%s1491_s2] sm:$0xf] }
 0x4b7   :  { %vm852_vm6 = vcmp.eq.f32.partialorder %v772_v45, 2.0  ;;  %vm851_vm7 = vcmp.eq.f32.partialorder %v772_v45, 1.0  ;;  %vm850_vm8 = vcmp.eq.f32.partialorder %v772_v45, 0.0 }
 0x4b8   :  { %v482_v47 = vmul.f32 0.01, %v471_v46  ;;  %vm478_vm1 = vcmp.gt.f32.partialorder %v471_v46, 0.0  ;;  %v865_v62 = vsel %vm850_vm8, 1, %v1004_v44 }
 0x4ba   :  { %v486_v48 = vsel %vm478_vm1, %v471_v46, %v482_v47  ;;  %v1007_v46 = vmov 126   ;;  %v853_v47 = vsel %vm852_vm6, 1, %v1004_v44 }
 0x4bb   :  { %929 = vmatmul.msk.f32.gmra.mxu0 %vm141_vm2, %v486_v48 }
 0x4bd   :  { %v473_v50 = vpop.f32.mrf.mxu2 }
 0x4be   :  { %v474_v51 = vadd.f32 %v971_v34, %v473_v50  ;;  %v1006_v34 = vmov 127   ;;  %v588_v50 = vld [vmem:[%s1492_s13 + $0x10] sm:$0xff] }
 0x4c0   :  { %vm479_vm3 = vcmp.gt.f32.partialorder %v474_v51, 0.0  ;;  %v483_v52 = vmul.f32 0.01, %v474_v51 }
 0x4c2   :  { %v487_v53 = vsel %vm479_vm3, %v474_v51, %v483_v52  ;;  %v616_v51 = vld [vmem:[%s1493_s26 + $0x10] sm:$0xff]  ;;  %v617_v52 = vld [vmem:[%s1493_s26 + $0x18] sm:$0xff] }
 0x4c3   :  { %930 = vmatmul.msk.f32.vlgmr.msrb.gmra.mxu2 %vm141_vm2, %v487_v53  ;;  %578 = vmatpush.msra.mxu3 %v487_v53  ;;  %v644_v53 = vadd.f32 %v616_v51, %v588_v50 }
 0x4c5   :  { %579 = vmatpush.msra.mxu3 %v486_v48  ;;  %v859_v48 = vsel %vm851_vm7, 1, %v1004_v44 }
 0x4c7   :  { %580 = vmatpush.msra.mxu3 %v485_v42  ;;  %v771_v42 = vld [vmem:[%s1490_s15] sm:$0xf] }
 0x4c8   :  { %v836_v43 = vadd.s32 1, %v771_v42 }
 0x4c9   :  { %581 = vmatpush.msra.mxu3 %v484_v38 }
 0x4ca   :  { %935 = vmatmul.msk.f32.vlgmr.msra.gmra.mxu3 %vm141_vm2, %v1259_v24 }
 0x4cb   :  { %705 = vmatpush.msrb.mxu3 %v681_v54 }
 0x4cd   :  { %706 = vmatpush.msrb.mxu3 %v680_v55  ;;  %v615_v55 = vld [vmem:[%s1493_s26 + $0x8] sm:$0xff] }
 0x4cf   :  { %707 = vmatpush.msrb.mxu3 %v679_v56  ;;  %v587_v56 = vld [vmem:[%s1492_s13 + $0x8] sm:$0xff] }
 0x4d1   :  { %708 = vmatpush.msrb.mxu3 %v678_v57  ;;  %v643_v57 = vadd.f32 %v615_v55, %v587_v56 }
 0x4d2   :  { %937 = vmatmul.msk.f32.vlgmr.msrb.gmra.mxu3 %vm141_vm2, %v395_v33 }
 0x528   :  { %v522_v1 = vpop.f32.mrf.mxu0 }
 0x530   :  { %v525_v7 = vpop.f32.mrf.mxu0 }
 0x538   :  { %v528_v14 = vpop.f32.mrf.mxu0 }
 0x546   :  { %v531_v8 = vpop.f32.mrf.mxu2 }
 0x547   :  { %549 = vmatpush.msra.mxu1 %v531_v8 }
 0x549   :  { %550 = vmatpush.msra.mxu1 %v528_v14 }
 0x54b   :  { %551 = vmatpush.msra.mxu1 %v525_v7 }
 0x54d   :  { %552 = vmatpush.msra.mxu1 %v522_v1  ;;  %v583_v15 = vpop.f32.mrf.mxu3 }
 0x54e   :  { %931 = vmatmul.msk.f32.vlgmr.msra.gmra.mxu1 %vm141_vm2, %v1161_v10 }
 0x555   :  { %v710_v21 = vpop.f32.mrf.mxu3 }
 0x556   :  { %v711_v22 = vadd.f32 %v710_v21, %v689_v19  ;;  %932 = vmatmul.msk.f32.gmra.mxu1 %vm141_vm2, %v1168_v11  ;;  %v648_v11 = vld [vmem:[%s1462_s18 + $0x10] sm:$0xff] }
 0x557   :  { %670 = vmatpush.msra.mxu2 %v648_v11 }
 0x558   :  { %v720_v25 = vadd.f32 %v719_v20, %v711_v22 }
 0x55a   :  { %v725_v26 = vadd.f32 %v974_v23, %v720_v25  ;;  %v769_v23 = vlaneseq }
 0x55c   :  { %v727_v27 = vmul.f32 0.01, %v725_v26  ;;  %vm726_vm4 = vcmp.gt.f32.partialorder %v725_v26, 0.0  ;;  %v770_v25 = vand.u32 127, %v769_v23 }
 0x55e   :  { %933 = vmatmul.msk.f32.gmra.mxu1 %vm141_vm2, %v1175_v12  ;;  %v728_v10 = vsel %vm726_vm4, %v725_v26, %v727_v27  ;;  %v647_v12 = vld [vmem:[%s1462_s18 + $0x8] sm:$0xff]  ;;  %vm821_vm9 = vcmp.ge.s32.totalorder %v770_v25, 21  ;;  %vm822_vm10 = vcmp.lt.s32.totalorder %v770_v25, 26  ;;  %vm816_vm15 = vcmp.ge.s32.totalorder %v770_v25, 16 }
 0x55f   :  { %938 = vmatmul.msk.f32.vlgmr.msrb.gmra.mxu0 %vm745_vm5, %v728_v10  ;;  %671 = vmatpush.msra.mxu2 %v647_v12  ;;  %vm823_vm13 = vmand %vm821_vm9, %vm822_vm10  ;;  %vm817_vm0 = vcmp.lt.s32.totalorder %v770_v25, 21  ;;  %vm793_vm1 = vcmp.eq.s32.totalorder %v770_v25, 42  ;;  %v1008_v10 = vmov 0.0  }
 0x566   :  { %934 = vmatmul.msk.f32.gmra.mxu1 %vm141_vm2, %v1182_v13  ;;  %v646_v13 = vld [vmem:[%s1462_s18] sm:$0xff] }
 0x567   :  { %672 = vmatpush.msra.mxu2 %v646_v13  ;;  %v940_v13 = vsel %vm793_vm1, 1.0, %v1008_v10 }
 0x568   :  { %936 = vmatmul.msk.f32.vlgmr.msra.gmra.mxu2 %vm141_vm2, %v583_v15 }
 0x5cb   :  { %v554_v30 = vpop.f32.mrf.mxu1 }
 0x5cc   :  { %v555_v31 = vadd.f32 %v975_v29, %v554_v30 }
 0x5ce   :  { %592 = vperm.xlu0 %960, %v555_v31  }
 0x5d3   :  { %v557_v32 = vpop.f32.mrf.mxu1 }
 0x5d4   :  { %v558_v33 = vadd.f32 %v975_v29, %v557_v32 }
 0x5d6   :  { %597 = vperm.xlu1 %957, %v558_v33   ;;  %965 = vset.pattern.permute.xlu0 %v1006_v34 }
 0x5db   :  { %v560_v36 = vpop.f32.mrf.mxu1 }
 0x5dc   :  { %v561_v37 = vadd.f32 %v975_v29, %v560_v36  ;;  %v766_v38 = vpop.f32.mrf.mxu0 }
 0x5dd   :  { %v1385_v39 = vadd.f32 %v976_v35, %v766_v38  ;;  %v977_v35 = vld [vmem:[%s1463_s19] ss:$0 sm:$0xff] }
 0x5de   :  { %602 = vperm.xlu2 %958, %v561_v37  }
 0x5df   :  { %842 = vperm.xlu0 %965, %v1385_v39  }
 0x5e3   :  { %v563_v40 = vpop.f32.mrf.mxu1 }
 0x5e4   :  { %v564_v41 = vadd.f32 %v975_v29, %v563_v40 }
 0x5e6   :  { %959 = vset.pattern.permute.xlu2 %v1005_v49  ;;  %607 = vperm.xlu1 %957, %v564_v41  }
 0x5e7   :  { %627 = vperm.xlu2 %959, %v561_v37   ;;  %967 = vset.pattern.permute.xlu0 %v1004_v44 }
 0x5eb   :  { %v674_v29 = vpop.f32.mrf.mxu2 }
 0x5ee   :  { %961 = vset.pattern.permute.xlu1 %v1005_v49  ;;  %v589_v49 = vld [vmem:[%s1492_s13 + $0x18] sm:$0xff] }
 0x5ef   :  { %623 = vperm.xlu2 %959, %v558_v33   ;;  %631 = vperm.xlu1 %961, %v564_v41   ;;  %v645_v54 = vadd.f32 %v617_v52, %v589_v49 }
 0x5f1   :  { %808 = vmatpush.msra.mxu3 %v645_v54 }
 0x5f3   :  { %809 = vmatpush.msra.mxu3 %v644_v53 }
 0x5f5   :  { %810 = vmatpush.msra.mxu3 %v643_v57 }
 0x5f7   :  { %962 = vset.pattern.permute.xlu2 %v1004_v44  ;;  %619 = vperm.xlu1 %961, %v555_v31  }
 0x5f8   :  { %827 = vperm.xlu2 %962, %v771_v42   ;;  %811 = vmatpush.msra.mxu3 %v642_v60  ;;  %v675_v42 = vadd.f32 %v977_v35, %v674_v29 }
 0x5f9   :  { %941 = vmatmul.msk.f32.vlgmr.msra.gmra.mxu3 %vm141_vm2, %v1259_v24 }
 0x5ff   :  { %963 = vset.pattern.permute.xlu1 %v1004_v44 }
 0x600   :  { %964 = vset.pattern.permute.xlu2 %v1007_v46  ;;  %838 = vperm.xlu1 %963, %v836_v43  }
 0x601   :  { %832 = vperm.xlu2 %964, %v1385_v39  }
 0x608   :  { %855 = vperm.xlu1 %963, %v853_v47  }
 0x609   :  { %966 = vset.pattern.permute.xlu2 %v1004_v44 }
 0x60a   :  { %861 = vperm.xlu2 %966, %v859_v48  }
 0x610   :  { %867 = vperm.xlu1 %963, %v865_v62  }
 0x638   :  { %v603_v61 = vpop.permute.xlu2 %602 }
 0x639   :  { %v612_v7 = vmul.f32 %v603_v61, %v588_v50 }
 0x640   :  { %v593_v16 = vpop.permute.xlu0 %592 }
 0x641   :  { %v628_v0 = vpop.permute.xlu2 %627  ;;  %v610_v44 = vmul.f32 %v593_v16, %v586_v58 }
 0x642   :  { %v636_v4 = vmul.f32 %v628_v0, %v616_v51 }
 0x644   :  { %v640_v15 = vadd.f32 %v636_v4, %v612_v7 }
 0x648   :  { %v598_v63 = vpop.permute.xlu1 %597 }
 0x649   :  { %v624_v2 = vpop.permute.xlu2 %623  ;;  %v611_v9 = vmul.f32 %v598_v63, %v587_v56 }
 0x64a   :  { %v635_v8 = vmul.f32 %v624_v2, %v615_v55 }
 0x64c   :  { %v639_v17 = vadd.f32 %v635_v8, %v611_v9 }
 0x651   :  { %v843_v11 = vpop.permute.xlu0 %842 }
 0x652   :  { %v828_v21 = vpop.permute.xlu2 %827 }
 0x653   :  { %vm829_vm11 = vcmp.eq.s32.totalorder %v770_v25, %v828_v21 }
 0x658   :  { %v608_v1 = vpop.permute.xlu1 %607 }
 0x659   :  { %v613_v5 = vmul.f32 %v608_v1, %v589_v49 }
 0x65b   :  { %v833_v26 = vpop.permute.xlu2 %832 }
 0x65c   :  { %v835_v36 = vsel %vm829_vm11, %v833_v26, 0.0 }
 0x661   :  { %v632_v3 = vpop.permute.xlu1 %631 }
 0x662   :  { %v637_v6 = vmul.f32 %v632_v3, %v617_v52 }
 0x664   :  { %v641_v14 = vadd.f32 %v637_v6, %v613_v5  ;;  %v862_v12 = vpop.permute.xlu2 %861 }
 0x665   :  { %vm863_vm4 = vcmp.eq.s32.totalorder %v862_v12, 1 }
 0x666   :  { %785 = vmatpush.msrb.mxu2 %v641_v14 }
 0x668   :  { %786 = vmatpush.msrb.mxu2 %v640_v15 }
 0x669   :  { %v620_v18 = vpop.permute.xlu1 %619 }
 0x66a   :  { %v634_v19 = vmul.f32 %v620_v18, %v614_v59  ;;  %787 = vmatpush.msrb.mxu2 %v639_v17 }
 0x66c   :  { %v638_v20 = vadd.f32 %v634_v19, %v610_v44 }
 0x66e   :  { %788 = vmatpush.msrb.mxu2 %v638_v20 }
 0x66f   :  { %939 = vmatmul.msk.f32.vlgmr.msrb.gmra.mxu2 %vm141_vm2, %v1259_v24  ;;  %v943_v24 = vsel %vm823_vm13, 1.0, %v1008_v10  ;;  %vm818_vm2 = vmand %vm816_vm15, %vm817_vm0 }
 0x670   :  { %v942_v33 = vsel %vm818_vm2, 1.0, %v1008_v10 }
 0x672   :  { %v839_v22 = vpop.permute.xlu1 %838 }
 0x673   :  { %vm840_vm12 = vcmp.eq.s32.totalorder %v770_v25, %v839_v22 }
 0x674   :  { %vm847_vm14 = vmor %vm829_vm11, %vm840_vm12  ;;  %v845_v31 = vsel %vm840_vm12, %v843_v11, 0.0 }
 0x675   :  { %v944_v28 = vsel %vm847_vm14, 1.0, %v1008_v10  ;;  %v846_v38 = vadd.f32 %v845_v31, %v835_v36 }
 0x67a   :  { %v856_v27 = vpop.permute.xlu1 %855 }
 0x67b   :  { %vm857_vm3 = vcmp.eq.s32.totalorder %v856_v27, 1 }
 0x67c   :  { %v813_v30 = vpop.f32.mrf.mxu3  ;;  %v871_v32 = vsel %vm857_vm3, %v943_v24, %v944_v28  ;;  %v858_v41 = vsel %vm857_vm3, %v1385_v39, %v846_v38 }
 0x67d   :  { %v814_v37 = vadd.f32 %v940_v13, %v813_v30  ;;  %v872_v40 = vsel %vm863_vm4, %v942_v33, %v871_v32  ;;  %v864_v47 = vsel %vm863_vm4, %v1385_v39, %v858_v41 }
 0x682   :  { %v868_v34 = vpop.permute.xlu1 %867 }
 0x683   :  { %vm869_vm5 = vcmp.eq.s32.totalorder %v868_v34, 1 }
 0x684   :  { %v873_v43 = vsel %vm869_vm5, %v814_v37, %v872_v40 }
 0x685   :  { %vm874_vm6 = vcmp.gt.f32.partialorder %v873_v43, 0.5 }
 0x6f2   :  { %v790_v45 = vpop.f32.mrf.mxu2 }
 0x6f3   :  { %v791_v46 = vadd.f32 %v790_v45, %v675_v42 }
 0x6f5   :  { %v870_v48 = vsel %vm869_vm5, %v791_v46, %v864_v47 }
 0x6f6   :  { %v875_v49 = vsel %vm874_vm6, %v870_v48, nan }
 0x6f7   :  { %876 = vst [vmem:[#allocation2] sm:$0xf] %v875_v49 }
 0x6f8   :  { %887 = dma.vmem_to_hbm [thread:$0]  %s883_s17, 64, %s885_s24, [#allocation3]  }
 0x6f9   :  { %1002 = dma.done.wait [#allocation3], 64  }
 0x6fa   :  { %1003 = vsyncadd [#allocation3], 4294967232 }
 0x6fb   :  { %892 = vsyncpa [#allocation3], 1 }

</bundles_post_ra>
